<compile_context>
chip_gen: v7x
topology: tpu7x:2x2x1
jax: 0.10.0
libtpu: 0.0.40
codegen_flags: <defaults>
</compile_context>

<pallas_src>
import jax
import jax.numpy as jnp
from jax.experimental import pallas as pl
from jax.experimental.pallas import tpu as pltpu

# ---- Module / test hyper-parameters (small, consistent with the module) ----
B = 2
CIN = 4                    # inplanes
COUT = 8                   # outplanes
K = 4                      # kernel_size (default)
STRIDE = 1                 # default
PADDING = 0                # default
H_IN = W_IN = 16
H_OUT = (H_IN - 1) * STRIDE - 2 * PADDING + (K - 1) + 1        # = 19
W_OUT = (W_IN - 1) * STRIDE - 2 * PADDING + (K - 1) + 1        # = 19
EPS = 1e-5                 # InstanceNorm2d default eps

WPAD = 24                  # padded row stride (>= W_OUT, multiple of 8)
LPAD = 512                 # padded lane count: multiple of 128, >= H_OUT*WPAD + (K-1)
NPIX = float(H_OUT * W_OUT)


def genblock_kernel(x_ref, w_ref, gb_ref, mask_ref, o_ref):
    # x_ref   : (1, CIN, LPAD)   lane l = h*WPAD + w; zeros at w >= W_IN and l >= H_IN*WPAD
    # w_ref   : (K, K*COUT, CIN) w_ref[kh, kw*COUT+co, ci] = w_torch[ci, co, kh, kw]
    # gb_ref  : (COUT, 2)        column 0 = gamma, column 1 = beta
    # mask_ref: (1, LPAD)        1.0 on the 19x19 valid output lanes, else 0.0
    # o_ref   : (1, COUT, LPAD)  channel-major padded output slab (sliced to NCHW in wrapper)
    x = x_ref[0]                                                   # (CIN, LPAD)

    # ---- ConvTranspose2d: 4 MXU pushes + 16 lane-shifted register adds ----
    # Real data lands only at valid output lanes; every other lane of acc stays
    # exactly 0 (padded input columns contribute 0, rolls only wrap zero lanes).
    acc = jnp.zeros((COUT, LPAD), jnp.float32)
    for kh in range(K):
        # rows = kw*COUT + co, lanes = input spatial positions (stride WPAD)
        t_kh = jax.lax.dot_general(w_ref[kh], x, (((1,), (0,)), ((), ())),
                                   preferred_element_type=jnp.float32)  # (K*COUT, LPAD)
        part = jnp.zeros((COUT, LPAD), jnp.float32)
        for kw in range(K):
            contrib = t_kh[kw * COUT:(kw + 1) * COUT, :]           # (COUT, LPAD), sublane aligned
            shift = kh * WPAD + kw
            if shift:
                contrib = pltpu.roll(contrib, shift, axis=1)       # XLU lane shift; wrapped lanes are 0
            part = part + contrib
        acc = acc + part

    # ---- InstanceNorm2d (affine, biased variance) + ReLU ----
    mask = mask_ref[...]                                            # (1, LPAD)
    mean = jnp.sum(acc, axis=1, keepdims=True) * (1.0 / NPIX)       # halo lanes are exactly zero
    diff = (acc - mean) * mask                                      # masked two-pass variance
    var = jnp.sum(diff * diff, axis=1, keepdims=True) * (1.0 / NPIX)
    gamma = gb_ref[:, 0:1]                                          # (COUT, 1)
    beta = gb_ref[:, 1:2]                                           # (COUT, 1)
    scale = gamma * jax.lax.rsqrt(var + EPS)
    # Single lane-dense store of the whole block (halo lanes sliced off in wrapper).
    o_ref[0] = jnp.maximum((acc - mean) * scale + beta, 0.0)


@jax.jit
def generator_block_forward(x_nchw, w_convt, gamma, beta):
    """x_nchw: (B, CIN, H_IN, W_IN) float32 (PyTorch layout).
    w_convt: (CIN, COUT, K, K) — nn.ConvTranspose2d weight layout.
    gamma, beta: (COUT,) — InstanceNorm2d affine parameters.
    Returns (B, COUT, H_OUT, W_OUT) NCHW."""
    assert x_nchw.shape == (B, CIN, H_IN, W_IN), x_nchw.shape
    assert w_convt.shape == (CIN, COUT, K, K), w_convt.shape
    assert gamma.shape == (COUT,) and beta.shape == (COUT,), (gamma.shape, beta.shape)

    # Input layout prep (tiny pads/reshapes, no transposes): lanes l = h*WPAD + w.
    x_w = jnp.pad(x_nchw, ((0, 0), (0, 0), (0, 0), (0, WPAD - W_IN)))
    x_slab = jnp.pad(x_w.reshape(B, CIN, H_IN * WPAD),
                     ((0, 0), (0, 0), (0, LPAD - H_IN * WPAD)))     # (B, CIN, LPAD)

    # Weights: (CIN, COUT, K, K) -> (K, K*COUT, CIN), row index = kw*COUT + co.
    w_all = jnp.transpose(w_convt, (2, 3, 1, 0)).reshape(K, K * COUT, CIN)
    gb = jnp.stack([gamma, beta], axis=1)                           # (COUT, 2)

    # Valid-lane mask for the variance pass (constant input, fetched once).
    lane = jnp.arange(LPAD, dtype=jnp.int32)
    valid = (lane < H_OUT * WPAD) & ((lane % WPAD) < W_OUT)
    mask = valid.astype(jnp.float32).reshape(1, LPAD)

    out_slab = pl.pallas_call(
        genblock_kernel,
        out_shape=jax.ShapeDtypeStruct((B, COUT, LPAD), jnp.float32),
        grid=(B,),
        in_specs=[
            pl.BlockSpec((1, CIN, LPAD), lambda b: (b, 0, 0)),
            pl.BlockSpec((K, K * COUT, CIN), lambda b: (0, 0, 0)),
            pl.BlockSpec((COUT, 2), lambda b: (0, 0)),
            pl.BlockSpec((1, LPAD), lambda b: (0, 0)),
        ],
        out_specs=pl.BlockSpec((1, COUT, LPAD), lambda b: (b, 0, 0)),
        compiler_params=pltpu.CompilerParams(
            dimension_semantics=("parallel",)),
    )(x_slab, w_all, gb, mask)

    # Back to NCHW (B, COUT, 19, 19) — cheap slice/reshape outside the kernel.
    out = out_slab[:, :, :H_OUT * WPAD].reshape(B, COUT, H_OUT, WPAD)
    return out[:, :, :, :W_OUT]


def reference_forward(x_nchw, w_convt, gamma, beta):
    """Plain-JAX reference: ConvTranspose2d (scatter definition) + InstanceNorm + ReLU."""
    y = jnp.zeros((B, COUT, H_OUT, W_OUT), jnp.float32)
    for kh in range(K):
        for kw in range(K):
            contrib = jnp.einsum('bchw,cd->bdhw', x_nchw, w_convt[:, :, kh, kw])
            y = y.at[:, :, kh:kh + H_IN, kw:kw + W_IN].add(contrib)
    mean = jnp.mean(y, axis=(2, 3), keepdims=True)
    var = jnp.var(y, axis=(2, 3), keepdims=True)                    # biased, like InstanceNorm
    yn = (y - mean) / jnp.sqrt(var + EPS)
    yn = yn * gamma.reshape(1, COUT, 1, 1) + beta.reshape(1, COUT, 1, 1)
    return jnp.maximum(yn, 0.0)


if __name__ == "__main__":
    key = jax.random.PRNGKey(0)
    kx, kw, kg, kb = jax.random.split(key, 4)
    x = jax.random.normal(kx, (B, CIN, H_IN, W_IN), jnp.float32)       # NCHW like PyTorch
    w = 0.1 * jax.random.normal(kw, (CIN, COUT, K, K), jnp.float32)    # ConvTranspose2d weight
    gamma = jax.random.uniform(kg, (COUT,), jnp.float32, 0.5, 1.5)
    beta = 0.1 * jax.random.normal(kb, (COUT,), jnp.float32)

    out = jax.block_until_ready(generator_block_forward(x, w, gamma, beta))
    ref = jax.block_until_ready(reference_forward(x, w, gamma, beta))

    assert out.shape == (B, COUT, H_OUT, W_OUT), out.shape
    max_err = float(jnp.max(jnp.abs(out - ref)))
    assert jnp.allclose(out, ref, atol=1e-3, rtol=1e-3), max_err

    print("KERNEL_OK")
</pallas_src>

<mosaic_0001>
module attributes {stable_mosaic.version = 11 : i64} {
  func.func @genblock_kernel(%arg0: i32, %arg1: memref<1x4x512xf32, #tpu.memory_space<vmem>>, %arg2: memref<4x32x4xf32, #tpu.memory_space<vmem>>, %arg3: memref<8x2xf32, #tpu.memory_space<vmem>>, %arg4: memref<1x512xf32, #tpu.memory_space<vmem>>, %arg5: memref<1x8x512xf32, #tpu.memory_space<vmem>>) attributes {dimension_semantics = [#tpu.dimension_semantics<parallel>], iteration_bounds = array<i64: 2>, scalar_prefetch = 0 : i64, scratch_operands = 0 : i64, tpu.core_type = #tpu.core_type<tc>, window_params = [{transform_indices = @transform_0, window_bounds = array<i64: 1, 4, 512>}, {pipeline_mode = #tpu.pipeline_mode<synchronous>, transform_indices = @transform_1, window_bounds = array<i64: 4, 32, 4>}, {pipeline_mode = #tpu.pipeline_mode<synchronous>, transform_indices = @transform_2, window_bounds = array<i64: 8, 2>}, {pipeline_mode = #tpu.pipeline_mode<synchronous>, transform_indices = @transform_3, window_bounds = array<i64: 1, 512>}, {transform_indices = @transform_4, window_bounds = array<i64: 1, 8, 512>}]} {
    %c0 = arith.constant 0 : index
    %c0_0 = arith.constant 0 : index
    %c0_1 = arith.constant 0 : index
    %0 = vector.load %arg1[%c0, %c0_0, %c0_1] : memref<1x4x512xf32, #tpu.memory_space<vmem>>, vector<1x4x512xf32>
    %1 = vector.shape_cast %0 : vector<1x4x512xf32> to vector<4x512xf32>
    %cst = arith.constant 0.000000e+00 : f32
    %2 = vector.broadcast %cst : f32 to vector<8x512xf32>
    %c0_2 = arith.constant 0 : index
    %c0_3 = arith.constant 0 : index
    %c0_4 = arith.constant 0 : index
    %3 = vector.load %arg2[%c0_2, %c0_3, %c0_4] : memref<4x32x4xf32, #tpu.memory_space<vmem>>, vector<1x32x4xf32>
    %4 = vector.shape_cast %3 : vector<1x32x4xf32> to vector<32x4xf32>
    %cst_5 = arith.constant dense<0.000000e+00> : vector<32x512xf32>
    %5 = tpu.matmul %4, %1, %cst_5 {dimension_numbers = #tpu.dot_dimension_numbers<[1], [0], [0], [1], [0, 0, 1, 1], [], []>} : vector<32x4xf32>, vector<4x512xf32>, vector<32x512xf32> -> vector<32x512xf32>
    %cst_6 = arith.constant 0.000000e+00 : f32
    %6 = vector.broadcast %cst_6 : f32 to vector<8x512xf32>
    %7 = vector.extract_strided_slice %5 {offsets = [0, 0], sizes = [8, 512], strides = [1, 1]} : vector<32x512xf32> to vector<8x512xf32>
    %8 = arith.addf %6, %7 : vector<8x512xf32>
    %9 = vector.extract_strided_slice %5 {offsets = [8, 0], sizes = [8, 512], strides = [1, 1]} : vector<32x512xf32> to vector<8x512xf32>
    %c1_i32 = arith.constant 1 : i32
    %10 = tpu.dynamic_rotate %9 by %c1_i32 dim 1 : vector<8x512xf32>, i32 -> vector<8x512xf32>
    %11 = arith.addf %8, %10 : vector<8x512xf32>
    %12 = vector.extract_strided_slice %5 {offsets = [16, 0], sizes = [8, 512], strides = [1, 1]} : vector<32x512xf32> to vector<8x512xf32>
    %c2_i32 = arith.constant 2 : i32
    %13 = tpu.dynamic_rotate %12 by %c2_i32 dim 1 : vector<8x512xf32>, i32 -> vector<8x512xf32>
    %14 = arith.addf %11, %13 : vector<8x512xf32>
    %15 = vector.extract_strided_slice %5 {offsets = [24, 0], sizes = [8, 512], strides = [1, 1]} : vector<32x512xf32> to vector<8x512xf32>
    %c3_i32 = arith.constant 3 : i32
    %16 = tpu.dynamic_rotate %15 by %c3_i32 dim 1 : vector<8x512xf32>, i32 -> vector<8x512xf32>
    %17 = arith.addf %14, %16 : vector<8x512xf32>
    %18 = arith.addf %2, %17 : vector<8x512xf32>
    %c1 = arith.constant 1 : index
    %c0_7 = arith.constant 0 : index
    %c0_8 = arith.constant 0 : index
    %19 = vector.load %arg2[%c1, %c0_7, %c0_8] : memref<4x32x4xf32, #tpu.memory_space<vmem>>, vector<1x32x4xf32>
    %20 = vector.shape_cast %19 : vector<1x32x4xf32> to vector<32x4xf32>
    %cst_9 = arith.constant dense<0.000000e+00> : vector<32x512xf32>
    %21 = tpu.matmul %20, %1, %cst_9 {dimension_numbers = #tpu.dot_dimension_numbers<[1], [0], [0], [1], [0, 0, 1, 1], [], []>} : vector<32x4xf32>, vector<4x512xf32>, vector<32x512xf32> -> vector<32x512xf32>
    %cst_10 = arith.constant 0.000000e+00 : f32
    %22 = vector.broadcast %cst_10 : f32 to vector<8x512xf32>
    %23 = vector.extract_strided_slice %21 {offsets = [0, 0], sizes = [8, 512], strides = [1, 1]} : vector<32x512xf32> to vector<8x512xf32>
    %c24_i32 = arith.constant 24 : i32
    %24 = tpu.dynamic_rotate %23 by %c24_i32 dim 1 : vector<8x512xf32>, i32 -> vector<8x512xf32>
    %25 = arith.addf %22, %24 : vector<8x512xf32>
    %26 = vector.extract_strided_slice %21 {offsets = [8, 0], sizes = [8, 512], strides = [1, 1]} : vector<32x512xf32> to vector<8x512xf32>
    %c25_i32 = arith.constant 25 : i32
    %27 = tpu.dynamic_rotate %26 by %c25_i32 dim 1 : vector<8x512xf32>, i32 -> vector<8x512xf32>
    %28 = arith.addf %25, %27 : vector<8x512xf32>
    %29 = vector.extract_strided_slice %21 {offsets = [16, 0], sizes = [8, 512], strides = [1, 1]} : vector<32x512xf32> to vector<8x512xf32>
    %c26_i32 = arith.constant 26 : i32
    %30 = tpu.dynamic_rotate %29 by %c26_i32 dim 1 : vector<8x512xf32>, i32 -> vector<8x512xf32>
    %31 = arith.addf %28, %30 : vector<8x512xf32>
    %32 = vector.extract_strided_slice %21 {offsets = [24, 0], sizes = [8, 512], strides = [1, 1]} : vector<32x512xf32> to vector<8x512xf32>
    %c27_i32 = arith.constant 27 : i32
    %33 = tpu.dynamic_rotate %32 by %c27_i32 dim 1 : vector<8x512xf32>, i32 -> vector<8x512xf32>
    %34 = arith.addf %31, %33 : vector<8x512xf32>
    %35 = arith.addf %18, %34 : vector<8x512xf32>
    %c2 = arith.constant 2 : index
    %c0_11 = arith.constant 0 : index
    %c0_12 = arith.constant 0 : index
    %36 = vector.load %arg2[%c2, %c0_11, %c0_12] : memref<4x32x4xf32, #tpu.memory_space<vmem>>, vector<1x32x4xf32>
    %37 = vector.shape_cast %36 : vector<1x32x4xf32> to vector<32x4xf32>
    %cst_13 = arith.constant dense<0.000000e+00> : vector<32x512xf32>
    %38 = tpu.matmul %37, %1, %cst_13 {dimension_numbers = #tpu.dot_dimension_numbers<[1], [0], [0], [1], [0, 0, 1, 1], [], []>} : vector<32x4xf32>, vector<4x512xf32>, vector<32x512xf32> -> vector<32x512xf32>
    %cst_14 = arith.constant 0.000000e+00 : f32
    %39 = vector.broadcast %cst_14 : f32 to vector<8x512xf32>
    %40 = vector.extract_strided_slice %38 {offsets = [0, 0], sizes = [8, 512], strides = [1, 1]} : vector<32x512xf32> to vector<8x512xf32>
    %c48_i32 = arith.constant 48 : i32
    %41 = tpu.dynamic_rotate %40 by %c48_i32 dim 1 : vector<8x512xf32>, i32 -> vector<8x512xf32>
    %42 = arith.addf %39, %41 : vector<8x512xf32>
    %43 = vector.extract_strided_slice %38 {offsets = [8, 0], sizes = [8, 512], strides = [1, 1]} : vector<32x512xf32> to vector<8x512xf32>
    %c49_i32 = arith.constant 49 : i32
    %44 = tpu.dynamic_rotate %43 by %c49_i32 dim 1 : vector<8x512xf32>, i32 -> vector<8x512xf32>
    %45 = arith.addf %42, %44 : vector<8x512xf32>
    %46 = vector.extract_strided_slice %38 {offsets = [16, 0], sizes = [8, 512], strides = [1, 1]} : vector<32x512xf32> to vector<8x512xf32>
    %c50_i32 = arith.constant 50 : i32
    %47 = tpu.dynamic_rotate %46 by %c50_i32 dim 1 : vector<8x512xf32>, i32 -> vector<8x512xf32>
    %48 = arith.addf %45, %47 : vector<8x512xf32>
    %49 = vector.extract_strided_slice %38 {offsets = [24, 0], sizes = [8, 512], strides = [1, 1]} : vector<32x512xf32> to vector<8x512xf32>
    %c51_i32 = arith.constant 51 : i32
    %50 = tpu.dynamic_rotate %49 by %c51_i32 dim 1 : vector<8x512xf32>, i32 -> vector<8x512xf32>
    %51 = arith.addf %48, %50 : vector<8x512xf32>
    %52 = arith.addf %35, %51 : vector<8x512xf32>
    %c3 = arith.constant 3 : index
    %c0_15 = arith.constant 0 : index
    %c0_16 = arith.constant 0 : index
    %53 = vector.load %arg2[%c3, %c0_15, %c0_16] : memref<4x32x4xf32, #tpu.memory_space<vmem>>, vector<1x32x4xf32>
    %54 = vector.shape_cast %53 : vector<1x32x4xf32> to vector<32x4xf32>
    %cst_17 = arith.constant dense<0.000000e+00> : vector<32x512xf32>
    %55 = tpu.matmul %54, %1, %cst_17 {dimension_numbers = #tpu.dot_dimension_numbers<[1], [0], [0], [1], [0, 0, 1, 1], [], []>} : vector<32x4xf32>, vector<4x512xf32>, vector<32x512xf32> -> vector<32x512xf32>
    %cst_18 = arith.constant 0.000000e+00 : f32
    %56 = vector.broadcast %cst_18 : f32 to vector<8x512xf32>
    %57 = vector.extract_strided_slice %55 {offsets = [0, 0], sizes = [8, 512], strides = [1, 1]} : vector<32x512xf32> to vector<8x512xf32>
    %c72_i32 = arith.constant 72 : i32
    %58 = tpu.dynamic_rotate %57 by %c72_i32 dim 1 : vector<8x512xf32>, i32 -> vector<8x512xf32>
    %59 = arith.addf %56, %58 : vector<8x512xf32>
    %60 = vector.extract_strided_slice %55 {offsets = [8, 0], sizes = [8, 512], strides = [1, 1]} : vector<32x512xf32> to vector<8x512xf32>
    %c73_i32 = arith.constant 73 : i32
    %61 = tpu.dynamic_rotate %60 by %c73_i32 dim 1 : vector<8x512xf32>, i32 -> vector<8x512xf32>
    %62 = arith.addf %59, %61 : vector<8x512xf32>
    %63 = vector.extract_strided_slice %55 {offsets = [16, 0], sizes = [8, 512], strides = [1, 1]} : vector<32x512xf32> to vector<8x512xf32>
    %c74_i32 = arith.constant 74 : i32
    %64 = tpu.dynamic_rotate %63 by %c74_i32 dim 1 : vector<8x512xf32>, i32 -> vector<8x512xf32>
    %65 = arith.addf %62, %64 : vector<8x512xf32>
    %66 = vector.extract_strided_slice %55 {offsets = [24, 0], sizes = [8, 512], strides = [1, 1]} : vector<32x512xf32> to vector<8x512xf32>
    %c75_i32 = arith.constant 75 : i32
    %67 = tpu.dynamic_rotate %66 by %c75_i32 dim 1 : vector<8x512xf32>, i32 -> vector<8x512xf32>
    %68 = arith.addf %65, %67 : vector<8x512xf32>
    %69 = arith.addf %52, %68 : vector<8x512xf32>
    %c0_19 = arith.constant 0 : index
    %c0_20 = arith.constant 0 : index
    %70 = vector.load %arg4[%c0_19, %c0_20] : memref<1x512xf32, #tpu.memory_space<vmem>>, vector<1x512xf32>
    %cst_21 = arith.constant dense<0.000000e+00> : vector<8xf32>
    %71 = vector.multi_reduction <add>, %69, %cst_21 [1] : vector<8x512xf32> to vector<8xf32>
    %72 = vector.shape_cast %71 : vector<8xf32> to vector<8x1xf32>
    %cst_22 = arith.constant 0.00277008303 : f32
    %73 = vector.broadcast %cst_22 : f32 to vector<8x1xf32>
    %74 = arith.mulf %72, %73 : vector<8x1xf32>
    %75 = vector.broadcast %74 : vector<8x1xf32> to vector<8x512xf32>
    %76 = arith.subf %69, %75 : vector<8x512xf32>
    %77 = vector.broadcast %70 : vector<1x512xf32> to vector<8x512xf32>
    %78 = arith.mulf %76, %77 : vector<8x512xf32>
    %79 = arith.mulf %78, %78 : vector<8x512xf32>
    %cst_23 = arith.constant dense<0.000000e+00> : vector<8xf32>
    %80 = vector.multi_reduction <add>, %79, %cst_23 [1] : vector<8x512xf32> to vector<8xf32>
    %81 = vector.shape_cast %80 : vector<8xf32> to vector<8x1xf32>
    %cst_24 = arith.constant 0.00277008303 : f32
    %82 = vector.broadcast %cst_24 : f32 to vector<8x1xf32>
    %83 = arith.mulf %81, %82 : vector<8x1xf32>
    %c0_25 = arith.constant 0 : index
    %c0_26 = arith.constant 0 : index
    %84 = vector.load %arg3[%c0_25, %c0_26] : memref<8x2xf32, #tpu.memory_space<vmem>>, vector<8x1xf32>
    %c0_27 = arith.constant 0 : index
    %c1_28 = arith.constant 1 : index
    %85 = vector.load %arg3[%c0_27, %c1_28] : memref<8x2xf32, #tpu.memory_space<vmem>>, vector<8x1xf32>
    %cst_29 = arith.constant 9.99999974E-6 : f32
    %86 = vector.broadcast %cst_29 : f32 to vector<8x1xf32>
    %87 = arith.addf %83, %86 : vector<8x1xf32>
    %88 = math.rsqrt %87 : vector<8x1xf32>
    %89 = arith.mulf %84, %88 : vector<8x1xf32>
    %90 = vector.broadcast %74 : vector<8x1xf32> to vector<8x512xf32>
    %91 = arith.subf %69, %90 : vector<8x512xf32>
    %92 = vector.broadcast %89 : vector<8x1xf32> to vector<8x512xf32>
    %93 = arith.mulf %91, %92 : vector<8x512xf32>
    %94 = vector.broadcast %85 : vector<8x1xf32> to vector<8x512xf32>
    %95 = arith.addf %93, %94 : vector<8x512xf32>
    %cst_30 = arith.constant 0.000000e+00 : f32
    %96 = vector.broadcast %cst_30 : f32 to vector<8x512xf32>
    %97 = arith.maximumf %95, %96 : vector<8x512xf32>
    %c0_31 = arith.constant 0 : index
    %c0_32 = arith.constant 0 : index
    %c0_33 = arith.constant 0 : index
    %98 = vector.load %arg5[%c0_31, %c0_32, %c0_33] : memref<1x8x512xf32, #tpu.memory_space<vmem>>, vector<1x8x512xf32>
    %99 = vector.shape_cast %98 : vector<1x8x512xf32> to vector<8x512xf32>
    %100 = vector.shape_cast %97 : vector<8x512xf32> to vector<1x8x512xf32>
    tpu.vector_store %arg5[%c0_31, %c0_32, %c0_33], %100 {strides = array<i32>} : memref<1x8x512xf32, #tpu.memory_space<vmem>>, vector<1x8x512xf32>,
    return
  }
  func.func @transform_0(%arg0: i32) -> (i32, i32, i32) {
    %c0_i32 = arith.constant 0 : i32
    %c0_i32_0 = arith.constant 0 : i32
    %c0_i32_1 = arith.constant 0 : i32
    return %arg0, %c0_i32, %c0_i32_0 : i32, i32, i32
  }
  func.func @transform_1(%arg0: i32) -> (i32, i32, i32) {
    %c0_i32 = arith.constant 0 : i32
    %c0_i32_0 = arith.constant 0 : i32
    %c0_i32_1 = arith.constant 0 : i32
    %c0_i32_2 = arith.constant 0 : i32
    return %c0_i32, %c0_i32_0, %c0_i32_1 : i32, i32, i32
  }
  func.func @transform_2(%arg0: i32) -> (i32, i32) {
    %c0_i32 = arith.constant 0 : i32
    %c0_i32_0 = arith.constant 0 : i32
    %c0_i32_1 = arith.constant 0 : i32
    return %c0_i32, %c0_i32_0 : i32, i32
  }
  func.func @transform_3(%arg0: i32) -> (i32, i32) {
    %c0_i32 = arith.constant 0 : i32
    %c0_i32_0 = arith.constant 0 : i32
    %c0_i32_1 = arith.constant 0 : i32
    return %c0_i32, %c0_i32_0 : i32, i32
  }
  func.func @transform_4(%arg0: i32) -> (i32, i32, i32) {
    %c0_i32 = arith.constant 0 : i32
    %c0_i32_0 = arith.constant 0 : i32
    %c0_i32_1 = arith.constant 0 : i32
    return %arg0, %c0_i32, %c0_i32_0 : i32, i32, i32
  }
}

</mosaic_0001>

<bundles_post_ra>
// kernel: generator_block_forward.1
= control target key start
LH: loop header
LB: loop body
LE: loop exit
PB: predicated region body
PF: predicated region fallthrough
CT: control target
= control target key end

     0   :  { %s1558_s15 = smov 0   ;;  %s1844_s0 = inlined_call_operand.vmem [shape: f32[2,4,512], index: 0, kind: input, shape index: {}]   ;;  %s1845_s1 = inlined_call_operand.vmem [shape: f32[4,32,4], index: 1, kind: input, shape index: {}]   ;;  %s1846_s2 = inlined_call_operand.vmem [shape: f32[8,2], index: 2, kind: input, shape index: {}]   ;;  %s1847_s3 = inlined_call_operand.vmem [shape: f32[1,512], index: 3, kind: input, shape index: {}]   ;;  %s1848_s4 = inlined_call_operand.vmem [shape: f32[2,8,512], index: 4, kind: output, shape index: {}]  }
   0x1 LB: > { %s1401_s16 = sadd.s32 4294967295, %s1513_s15   ;;  %p1405_p0 = scmp.ge.s32.totalorder %s1513_s15, 1  ;;  %s1513_s15 = sphi %s1558_s15, %s14_s15  }
   0x2   : > { %p162_p1 = scmp.lt.s32.totalorder %s1513_s15, 3 }
   0x4   : > { %p163_p2 = pnand %p1405_p0, %p162_p1 }
   0x5   : > { %p188_p3 = scmp.lt.s32.totalorder (!%p163_p2), %s1401_s16, 1  ;;  %v1515_v0 = vmov (!%p163_p2), 0.0   ;;  %vm221_vm0 = vcmask (!%p163_p2), 1043456   ;;  %v200_v5 = vld [vmem:[%s1845_s1] sm:$0xff] (!%p163_p2)  ;;  %vm208_vm1 = vcmask (!%p163_p2), 31744   ;;  %v201_v6 = vld [vmem:[%s1845_s1 + $0x8] sm:$0xff] (!%p163_p2) }
   0x6   : > { %166 = sbr.rel (%p163_p2) target bundleno = 930 (0x3a2), region = 36  ;;  %294 = vmatprep.mubr.f32.mxu0 (!%p163_p2), %v1515_v0  ;;  %383 = vmatprep.mubr.f32.mxu1 (!%p163_p2), %v1515_v0  ;;  %v202_v7 = vld [vmem:[%s1845_s1 + $0x10] sm:$0xff] (!%p163_p2)  ;;  %v203_v8 = vld [vmem:[%s1845_s1 + $0x18] sm:$0xff] (!%p163_p2)  ;;  %v1422_v9 = vld [vmem:[%s1845_s1 + $0x20] sm:$0xff] (!%p163_p2)  ;;  %s1516_s29 = smov (!%p163_p2), 1  }
   0x7   : > { %v1423_v10 = vld [vmem:[%s1845_s1 + $0x28] sm:$0xff] (!%p163_p2)  ;;  %v1424_v11 = vld [vmem:[%s1845_s1 + $0x30] sm:$0xff] (!%p163_p2)  ;;  %v1425_v12 = vld [vmem:[%s1845_s1 + $0x38] sm:$0xff] (!%p163_p2)  ;;  %s1517_s30 = smov (!%p163_p2), 2   ;;  %s1518_s5 = smov (!%p163_p2), 3  }
   0x8   : > { %v1438_v13 = vld [vmem:[%s1845_s1 + $0x40] sm:$0xff] (!%p163_p2)  ;;  %v1439_v14 = vld [vmem:[%s1845_s1 + $0x48] sm:$0xff] (!%p163_p2)  ;;  %v1440_v15 = vld [vmem:[%s1845_s1 + $0x50] sm:$0xff] (!%p163_p2)  ;;  %s1519_s6 = smov (!%p163_p2), 24   ;;  %s1520_s7 = smov (!%p163_p2), 25  }
   0x9   : > { %v1441_v16 = vld [vmem:[%s1845_s1 + $0x58] sm:$0xff] (!%p163_p2)  ;;  %v1454_v17 = vld [vmem:[%s1845_s1 + $0x60] sm:$0xff] (!%p163_p2)  ;;  %v1455_v18 = vld [vmem:[%s1845_s1 + $0x68] sm:$0xff] (!%p163_p2)  ;;  %s1521_s8 = smov (!%p163_p2), 26   ;;  %s1522_s9 = smov (!%p163_p2), 27  }
   0xa   : > { %v1456_v19 = vld [vmem:[%s1845_s1 + $0x70] sm:$0xff] (!%p163_p2)  ;;  %v1457_v20 = vld [vmem:[%s1845_s1 + $0x78] sm:$0xff] (!%p163_p2)  ;;  %s1523_s10 = smov (!%p163_p2), 48   ;;  %s1524_s11 = smov (!%p163_p2), 49  }
   0xb   : > { %s1525_s12 = smov (!%p163_p2), 50   ;;  %s1526_s13 = smov (!%p163_p2), 51  }
   0xc   : > { %s1527_s14 = smov (!%p163_p2), 72   ;;  %s1529_s18 = smov (!%p163_p2), 74  }
   0xd   : > { %s1850_s16 = smov (!%p188_p3, %s1401_s16), 1  ;;  %s1530_s19 = smov 75  }
   0xe   : > { %s1472_s17 = sshll.u32 %s1850_s16, 4  ;;  %s1473_s24 = sshll.u32 %s1850_s16, 5 }
   0xf   : > { %s192_s20 = scalar_lea.vmem %s1844_s0, %s1472_s17  ;;  %s1528_s17 = smov 73  }
  0x10   : > { %v1574_v1 = vld [vmem:[%s192_s20] sm:$0xff]  ;;  %v1576_v2 = vld [vmem:[%s192_s20 + $0x8] sm:$0xff]  ;;  %s197_s27 = scalar_lea.vmem %s1848_s4, %s1473_s24 }
  0x11   : > { %v206_v3 = vcombine.high %v1574_v1, %v1574_v1  ;;  %v207_v4 = vcombine.high %v1576_v2, %v1576_v2 }
  0x13   : > { %1410 = vmatprep.subr.msk.mxu0 %vm221_vm0, %v206_v3  ;;  %1416 = vmatprep.subr.msk.mxu1 %vm221_vm0, %v207_v4 }
  0x14   : > { %1411 = vmatpush1.msk.msra.mxu0 %vm221_vm0, %v1574_v1  ;;  %1417 = vmatpush1.msk.msra.mxu1 %vm221_vm0, %v1576_v2 }
  0x15   : > { %1412 = vmatmul.mubr.msk.f32.vlgmr.msra.gmra.mrb[0].mxu0 %vm208_vm1, %v200_v5  ;;  %1418 = vmatmul.mubr.msk.f32.vlgmr.msra.gmra.mrb[0].mxu1 %vm208_vm1, %v200_v5 }
  0x16   : > { %300 = vmatprep.mubr.f32.mxu0 %v1515_v0  ;;  %389 = vmatprep.mubr.f32.mxu1 %v1515_v0 }
  0x17   : > { %1426 = vmatprep.subr.msk.mxu0 %vm221_vm0, %v206_v3  ;;  %1432 = vmatprep.subr.msk.mxu1 %vm221_vm0, %v207_v4 }
  0x18   : > { %1427 = vmatpush1.msk.msra.mxu0 %vm221_vm0, %v1574_v1  ;;  %1433 = vmatpush1.msk.msra.mxu1 %vm221_vm0, %v1576_v2 }
  0x19   : > { %1413 = vmatmul.mubr.msk.f32.gmra.mrb[2].mxu0 %vm208_vm1, %v201_v6  ;;  %1419 = vmatmul.mubr.msk.f32.gmra.mrb[2].mxu1 %vm208_vm1, %v201_v6 }
  0x1a   : > { %306 = vmatprep.mubr.f32.mxu0 %v1515_v0  ;;  %395 = vmatprep.mubr.f32.mxu1 %v1515_v0 }
  0x1b   : > { %1442 = vmatprep.subr.msk.mxu0 %vm221_vm0, %v206_v3  ;;  %1448 = vmatprep.subr.msk.mxu1 %vm221_vm0, %v207_v4 }
  0x1d   : > { %1414 = vmatmul.mubr.msk.f32.gmra.mrb[4].mxu0 %vm208_vm1, %v202_v7  ;;  %1420 = vmatmul.mubr.msk.f32.gmra.mrb[4].mxu1 %vm208_vm1, %v202_v7 }
  0x1e   : > { %312 = vmatprep.mubr.f32.mxu0 %v1515_v0  ;;  %401 = vmatprep.mubr.f32.mxu1 %v1515_v0 }
  0x21   : > { %1415 = vmatmul.mubr.msk.f32.gmra.mrb[6].mxu0 %vm208_vm1, %v203_v8  ;;  %1421 = vmatmul.mubr.msk.f32.gmra.mrb[6].mxu1 %vm208_vm1, %v203_v8 }
  0x22   : > { %550 = vmatprep.mubr.f32.mxu0 %v1515_v0  ;;  %639 = vmatprep.mubr.f32.mxu1 %v1515_v0 }
  0x25   : > { %1428 = vmatmul.mubr.msk.f32.vlgmr.msra.gmra.mrb[8].mxu0 %vm208_vm1, %v1422_v9  ;;  %1434 = vmatmul.mubr.msk.f32.vlgmr.msra.gmra.mrb[8].mxu1 %vm208_vm1, %v1422_v9 }
  0x26   : > { %556 = vmatprep.mubr.f32.mxu0 %v1515_v0  ;;  %645 = vmatprep.mubr.f32.mxu1 %v1515_v0 }
  0x27   : > { %1443 = vmatpush1.msk.msra.mxu0 %vm221_vm0, %v1574_v1  ;;  %1449 = vmatpush1.msk.msra.mxu1 %vm221_vm0, %v1576_v2 }
  0x28   : > { %1458 = vmatprep.subr.msk.mxu0 %vm221_vm0, %v206_v3  ;;  %1464 = vmatprep.subr.msk.mxu1 %vm221_vm0, %v207_v4 }
  0x29   : > { %1429 = vmatmul.mubr.msk.f32.gmra.mrb[10].mxu0 %vm208_vm1, %v1423_v10  ;;  %1435 = vmatmul.mubr.msk.f32.gmra.mrb[10].mxu1 %vm208_vm1, %v1423_v10 }
  0x2a   : > { %651 = vmatprep.mubr.f32.mxu1 %v1515_v0  ;;  %562 = vmatprep.mubr.f32.mxu0 %v1515_v0 }
  0x2d   : > { %1436 = vmatmul.mubr.msk.f32.gmra.mrb[12].mxu1 %vm208_vm1, %v1424_v11  ;;  %1430 = vmatmul.mubr.msk.f32.gmra.mrb[12].mxu0 %vm208_vm1, %v1424_v11 }
  0x2e   : > { %657 = vmatprep.mubr.f32.mxu1 %v1515_v0  ;;  %568 = vmatprep.mubr.f32.mxu0 %v1515_v0 }
  0x31   : > { %1437 = vmatmul.mubr.msk.f32.gmra.mrb[14].mxu1 %vm208_vm1, %v1425_v12  ;;  %1431 = vmatmul.mubr.msk.f32.gmra.mrb[14].mxu0 %vm208_vm1, %v1425_v12 }
  0x32   : > { %817 = vmatprep.mubr.f32.mxu0 %v1515_v0  ;;  %906 = vmatprep.mubr.f32.mxu1 %v1515_v0 }
  0x35   : > { %1444 = vmatmul.mubr.msk.f32.vlgmr.msra.gmra.mrb[16].mxu0 %vm208_vm1, %v1438_v13  ;;  %1450 = vmatmul.mubr.msk.f32.vlgmr.msra.gmra.mrb[16].mxu1 %vm208_vm1, %v1438_v13 }
  0x36   : > { %823 = vmatprep.mubr.f32.mxu0 %v1515_v0  ;;  %912 = vmatprep.mubr.f32.mxu1 %v1515_v0 }
  0x37   : > { %1459 = vmatpush1.msk.msra.mxu0 %vm221_vm0, %v1574_v1  ;;  %1465 = vmatpush1.msk.msra.mxu1 %vm221_vm0, %v1576_v2 }
  0x39   : > { %1445 = vmatmul.mubr.msk.f32.gmra.mrb[18].mxu0 %vm208_vm1, %v1439_v14  ;;  %1451 = vmatmul.mubr.msk.f32.gmra.mrb[18].mxu1 %vm208_vm1, %v1439_v14 }
  0x3a   : > { %829 = vmatprep.mubr.f32.mxu0 %v1515_v0  ;;  %918 = vmatprep.mubr.f32.mxu1 %v1515_v0 }
  0x3d   : > { %1446 = vmatmul.mubr.msk.f32.gmra.mrb[20].mxu0 %vm208_vm1, %v1440_v15  ;;  %1452 = vmatmul.mubr.msk.f32.gmra.mrb[20].mxu1 %vm208_vm1, %v1440_v15 }
  0x3e   : > { %835 = vmatprep.mubr.f32.mxu0 %v1515_v0  ;;  %924 = vmatprep.mubr.f32.mxu1 %v1515_v0 }
  0x41   : > { %1447 = vmatmul.mubr.msk.f32.gmra.mrb[22].mxu0 %vm208_vm1, %v1441_v16  ;;  %1453 = vmatmul.mubr.msk.f32.gmra.mrb[22].mxu1 %vm208_vm1, %v1441_v16 }
  0x42   : > { %1084 = vmatprep.mubr.f32.mxu0 %v1515_v0  ;;  %1173 = vmatprep.mubr.f32.mxu1 %v1515_v0 }
  0x45   : > { %1460 = vmatmul.mubr.msk.f32.vlgmr.msra.gmra.mrb[24].mxu0 %vm208_vm1, %v1454_v17  ;;  %1466 = vmatmul.mubr.msk.f32.vlgmr.msra.gmra.mrb[24].mxu1 %vm208_vm1, %v1454_v17 }
  0x46   : > { %1090 = vmatprep.mubr.f32.mxu0 %v1515_v0  ;;  %1179 = vmatprep.mubr.f32.mxu1 %v1515_v0 }
  0x49   : > { %1461 = vmatmul.mubr.msk.f32.gmra.mrb[26].mxu0 %vm208_vm1, %v1455_v18  ;;  %1467 = vmatmul.mubr.msk.f32.gmra.mrb[26].mxu1 %vm208_vm1, %v1455_v18 }
  0x4a   : > { %1096 = vmatprep.mubr.f32.mxu0 %v1515_v0  ;;  %1185 = vmatprep.mubr.f32.mxu1 %v1515_v0 }
  0x4d   : > { %1462 = vmatmul.mubr.msk.f32.gmra.mrb[28].mxu0 %vm208_vm1, %v1456_v19  ;;  %1468 = vmatmul.mubr.msk.f32.gmra.mrb[28].mxu1 %vm208_vm1, %v1456_v19 }
  0x4e   : > { %1102 = vmatprep.mubr.f32.mxu0 %v1515_v0  ;;  %1191 = vmatprep.mubr.f32.mxu1 %v1515_v0 }
  0x51   : > { %1463 = vmatmul.mubr.msk.f32.gmra.mrb[30].mxu0 %vm208_vm1, %v1457_v20  ;;  %1469 = vmatmul.mubr.msk.f32.gmra.mrb[30].mxu1 %vm208_vm1, %v1457_v20 }
  0xe8   : > { %v1716_v21 = vpop.f32.mrb[0].mxu0  ;;  %v1718_v22 = vpop.f32.mrb[0].mxu1 }
  0xe9   : > { %v1720_v23 = vpop.f32.mrb[1].mxu0  ;;  %v1722_v24 = vpop.f32.mrb[1].mxu1 }
  0xec   : > { %v302_v25 = vpop.f32.mrb[2].mxu0  ;;  %v391_v26 = vpop.f32.mrb[2].mxu1 }
  0xed   : > { %416 = vrot.lane.b32.xlu1 %v391_v26, %s1516_s29  ;;  %412 = vrot.lane.b32.xlu0 %v302_v25, %s1516_s29  ;;  %v304_v27 = vpop.f32.mrb[3].mxu0  ;;  %v393_v28 = vpop.f32.mrb[3].mxu1  ;;  %v420_v25 = vlaneseq }
  0xef   : > { %v1725_v26 = vand.u32 127, %v420_v25 }
  0xf0   : > { %v308_v29 = vpop.f32.mrb[4].mxu0  ;;  %v397_v30 = vpop.f32.mrb[4].mxu1 }
  0xf1   : > { %418 = vrot.lane.b32.xlu1 %v393_v28, %s1516_s29  ;;  %414 = vrot.lane.b32.xlu0 %v304_v27, %s1516_s29  ;;  %v310_v31 = vpop.f32.mrb[5].mxu0  ;;  %v399_v32 = vpop.f32.mrb[5].mxu1  ;;  %vm422_vm2 = vcmp.lt.s32.totalorder %v1725_v26, 1  ;;  %vm439_vm3 = vcmp.lt.s32.totalorder %v1725_v26, 2  ;;  %vm456_vm4 = vcmp.lt.s32.totalorder %v1725_v26, 3  ;;  %vm672_vm5 = vcmp.lt.s32.totalorder %v1725_v26, 24 }
  0xf2   : > { %vm689_vm6 = vcmp.lt.s32.totalorder %v1725_v26, 25  ;;  %vm706_vm7 = vcmp.lt.s32.totalorder %v1725_v26, 26  ;;  %vm723_vm8 = vcmp.lt.s32.totalorder %v1725_v26, 27  ;;  %vm956_vm9 = vcmp.lt.s32.totalorder %v1725_v26, 49 }
  0xf3   : > { %vm939_vm10 = vcmp.lt.s32.totalorder %v1725_v26, 48  ;;  %vm973_vm11 = vcmp.lt.s32.totalorder %v1725_v26, 50  ;;  %vm990_vm12 = vcmp.lt.s32.totalorder %v1725_v26, 51  ;;  %vm1223_vm13 = vcmp.lt.s32.totalorder %v1725_v26, 73 }
  0xf4   : > { %v314_v33 = vpop.f32.mrb[6].mxu0  ;;  %v403_v34 = vpop.f32.mrb[6].mxu1  ;;  %vm1206_vm14 = vcmp.lt.s32.totalorder %v1725_v26, 72  ;;  %vm1240_vm15 = vcmp.lt.s32.totalorder %v1725_v26, 74  ;;  %vm1257_vm0 = vcmp.lt.s32.totalorder %v1725_v26, 75  ;;  %v1283_v26 = vshrl.u32 %v420_v25, 7 }
  0xf5   : > { %431 = vrot.lane.b32.xlu0 %v308_v29, %s1517_s30  ;;  %433 = vrot.lane.b32.xlu1 %v310_v31, %s1517_s30  ;;  %v316_v35 = vpop.f32.mrb[7].mxu0  ;;  %v405_v36 = vpop.f32.mrb[7].mxu1 }
  0xf8   : > { %v552_v37 = vpop.f32.mrb[8].mxu0  ;;  %v641_v38 = vpop.f32.mrb[8].mxu1 }
  0xf9   : > { %435 = vrot.lane.b32.xlu0 %v397_v30, %s1517_s30  ;;  %448 = vrot.lane.b32.xlu1 %v314_v33, %s1518_s5  ;;  %v554_v39 = vpop.f32.mrb[9].mxu0  ;;  %v643_v40 = vpop.f32.mrb[9].mxu1 }
  0xfc   : > { %v558_v41 = vpop.f32.mrb[10].mxu0  ;;  %v647_v42 = vpop.f32.mrb[10].mxu1 }
  0xfd   : > { %437 = vrot.lane.b32.xlu0 %v399_v32, %s1517_s30  ;;  %452 = vrot.lane.b32.xlu1 %v403_v34, %s1518_s5  ;;  %v560_v43 = vpop.f32.mrb[11].mxu0  ;;  %v649_v44 = vpop.f32.mrb[11].mxu1 }
 0x100   : > { %v653_v45 = vpop.f32.mrb[12].mxu1  ;;  %v564_v46 = vpop.f32.mrb[12].mxu0 }
 0x101   : > { %454 = vrot.lane.b32.xlu1 %v405_v36, %s1518_s5  ;;  %450 = vrot.lane.b32.xlu0 %v316_v35, %s1518_s5  ;;  %v655_v47 = vpop.f32.mrb[13].mxu1  ;;  %v566_v48 = vpop.f32.mrb[13].mxu0 }
 0x104   : > { %v659_v49 = vpop.f32.mrb[14].mxu1  ;;  %v570_v50 = vpop.f32.mrb[14].mxu0 }
 0x105   : > { %664 = vrot.lane.b32.xlu1 %v552_v37, %s1519_s6  ;;  %666 = vrot.lane.b32.xlu0 %v554_v39, %s1519_s6  ;;  %v661_v51 = vpop.f32.mrb[15].mxu1  ;;  %v572_v52 = vpop.f32.mrb[15].mxu0 }
 0x108   : > { %v819_v53 = vpop.f32.mrb[16].mxu0  ;;  %v908_v54 = vpop.f32.mrb[16].mxu1 }
 0x109   : > { %668 = vrot.lane.b32.xlu1 %v641_v38, %s1519_s6  ;;  %681 = vrot.lane.b32.xlu0 %v558_v41, %s1520_s7  ;;  %v821_v55 = vpop.f32.mrb[17].mxu0  ;;  %v910_v56 = vpop.f32.mrb[17].mxu1 }
 0x10c   : > { %v825_v57 = vpop.f32.mrb[18].mxu0  ;;  %v914_v58 = vpop.f32.mrb[18].mxu1 }
 0x10d   : > { %670 = vrot.lane.b32.xlu1 %v643_v40, %s1519_s6  ;;  %685 = vrot.lane.b32.xlu0 %v647_v42, %s1520_s7  ;;  %v827_v59 = vpop.f32.mrb[19].mxu0  ;;  %v916_v60 = vpop.f32.mrb[19].mxu1 }
 0x110   : > { %v831_v61 = vpop.f32.mrb[20].mxu0  ;;  %v920_v62 = vpop.f32.mrb[20].mxu1 }
 0x111   : > { %687 = vrot.lane.b32.xlu0 %v649_v44, %s1520_s7  ;;  %683 = vrot.lane.b32.xlu1 %v560_v43, %s1520_s7  ;;  %v833_v63 = vpop.f32.mrb[21].mxu0  ;;  %v922_v0 = vpop.f32.mrb[21].mxu1 }
 0x114   : > { %v837_v1 = vpop.f32.mrb[22].mxu0  ;;  %v926_v2 = vpop.f32.mrb[22].mxu1 }
 0x115   : > { %702 = vrot.lane.b32.xlu0 %v653_v45, %s1521_s8  ;;  %698 = vrot.lane.b32.xlu1 %v564_v46, %s1521_s8  ;;  %v839_v3 = vpop.f32.mrb[23].mxu0  ;;  %v928_v4 = vpop.f32.mrb[23].mxu1 }
 0x118   : > { %v1086_v5 = vpop.f32.mrb[24].mxu0  ;;  %v1175_v6 = vpop.f32.mrb[24].mxu1 }
 0x119   : > { %704 = vrot.lane.b32.xlu1 %v655_v47, %s1521_s8  ;;  %700 = vrot.lane.b32.xlu0 %v566_v48, %s1521_s8  ;;  %v1088_v7 = vpop.f32.mrb[25].mxu0  ;;  %v1177_v8 = vpop.f32.mrb[25].mxu1 }
 0x11c   : > { %v1092_v9 = vpop.f32.mrb[26].mxu0  ;;  %v1181_v10 = vpop.f32.mrb[26].mxu1 }
 0x11d   : > { %719 = vrot.lane.b32.xlu0 %v659_v49, %s1522_s9  ;;  %715 = vrot.lane.b32.xlu1 %v570_v50, %s1522_s9  ;;  %v1094_v11 = vpop.f32.mrb[27].mxu0  ;;  %v1183_v12 = vpop.f32.mrb[27].mxu1 }
 0x120   : > { %v1098_v13 = vpop.f32.mrb[28].mxu0  ;;  %v1187_v14 = vpop.f32.mrb[28].mxu1 }
 0x121   : > { %721 = vrot.lane.b32.xlu1 %v661_v51, %s1522_s9  ;;  %717 = vrot.lane.b32.xlu0 %v572_v52, %s1522_s9  ;;  %v1100_v15 = vpop.f32.mrb[29].mxu0  ;;  %v1189_v16 = vpop.f32.mrb[29].mxu1 }
 0x124   : > { %v1104_v17 = vpop.f32.mrb[30].mxu0  ;;  %v1193_v18 = vpop.f32.mrb[30].mxu1 }
 0x125   : > { %931 = vrot.lane.b32.xlu0 %v819_v53, %s1523_s10  ;;  %933 = vrot.lane.b32.xlu1 %v821_v55, %s1523_s10  ;;  %v1106_v19 = vpop.f32.mrb[31].mxu0  ;;  %v1195_v20 = vpop.f32.mrb[31].mxu1 }
 0x129   : > { %935 = vrot.lane.b32.xlu0 %v908_v54, %s1523_s10  ;;  %948 = vrot.lane.b32.xlu1 %v825_v57, %s1524_s11 }
 0x12d   : > { %937 = vrot.lane.b32.xlu0 %v910_v56, %s1523_s10  ;;  %952 = vrot.lane.b32.xlu1 %v914_v58, %s1524_s11 }
 0x131   : > { %954 = vrot.lane.b32.xlu1 %v916_v60, %s1524_s11  ;;  %950 = vrot.lane.b32.xlu0 %v827_v59, %s1524_s11 }
 0x135   : > { %969 = vrot.lane.b32.xlu1 %v920_v62, %s1525_s12  ;;  %965 = vrot.lane.b32.xlu0 %v831_v61, %s1525_s12 }
 0x139   : > { %971 = vrot.lane.b32.xlu0 %v922_v0, %s1525_s12  ;;  %967 = vrot.lane.b32.xlu1 %v833_v63, %s1525_s12 }
 0x13d   : > { %982 = vrot.lane.b32.xlu0 %v837_v1, %s1526_s13  ;;  %984 = vrot.lane.b32.xlu1 %v839_v3, %s1526_s13 }
 0x141   : > { %986 = vrot.lane.b32.xlu0 %v926_v2, %s1526_s13  ;;  %1198 = vrot.lane.b32.xlu1 %v1086_v5, %s1527_s14 }
 0x145   : > { %988 = vrot.lane.b32.xlu0 %v928_v4, %s1526_s13  ;;  %1202 = vrot.lane.b32.xlu1 %v1175_v6, %s1527_s14 }
 0x149   : > { %1204 = vrot.lane.b32.xlu1 %v1177_v8, %s1527_s14  ;;  %1200 = vrot.lane.b32.xlu0 %v1088_v7, %s1527_s14 }
 0x14d   : > { %1215 = vrot.lane.b32.xlu0 %v1092_v9, %s1528_s17  ;;  %1217 = vrot.lane.b32.xlu1 %v1094_v11, %s1528_s17 }
 0x151   : > { %1219 = vrot.lane.b32.xlu0 %v1181_v10, %s1528_s17  ;;  %1232 = vrot.lane.b32.xlu1 %v1098_v13, %s1529_s18 }
 0x155   : > { %1221 = vrot.lane.b32.xlu0 %v1183_v12, %s1528_s17  ;;  %1236 = vrot.lane.b32.xlu1 %v1187_v14, %s1529_s18 }
 0x159   : > { %1238 = vrot.lane.b32.xlu1 %v1189_v16, %s1529_s18  ;;  %1234 = vrot.lane.b32.xlu0 %v1100_v15, %s1529_s18 }
 0x15d   : > { %1249 = vrot.lane.b32.xlu0 %v1104_v17, %s1530_s19  ;;  %1251 = vrot.lane.b32.xlu1 %v1106_v19, %s1530_s19 }
 0x15f   : > { %v417_v27 = vpop.permute.xlu1 %416  ;;  %v413_v28 = vpop.permute.xlu0 %412 }
 0x161   : > { %1255 = vrot.lane.b32.xlu0 %v1195_v20, %s1530_s19  ;;  %1253 = vrot.lane.b32.xlu1 %v1193_v18, %s1530_s19 }
 0x163   : > { %v419_v29 = vpop.permute.xlu1 %418  ;;  %v415_v30 = vpop.permute.xlu0 %414 }
 0x164   : > { %v423_v31 = vsel %vm422_vm2, %v417_v27, %v419_v29  ;;  %v426_v32 = vsel %vm422_vm2, %v419_v29, %v413_v28  ;;  %v424_v33 = vsel %vm422_vm2, %v415_v30, %v417_v27  ;;  %v425_v34 = vsel %vm422_vm2, %v413_v28, %v415_v30 }
 0x165   : > { %v427_v35 = vadd.f32 %v426_v32, %v1716_v21  ;;  %v430_v36 = vadd.f32 %v423_v31, %v1722_v24  ;;  %v428_v37 = vadd.f32 %v425_v34, %v1720_v23  ;;  %v429_v38 = vadd.f32 %v424_v33, %v1718_v22 }
 0x167   : > { %v432_v39 = vpop.permute.xlu0 %431  ;;  %v434_v40 = vpop.permute.xlu1 %433 }
 0x168   : > { %v442_v41 = vsel %vm439_vm3, %v432_v39, %v434_v40 }
 0x169   : > { %v445_v42 = vadd.f32 %v442_v41, %v428_v37 }
 0x16b   : > { %v436_v43 = vpop.permute.xlu0 %435  ;;  %v449_v44 = vpop.permute.xlu1 %448 }
 0x16c   : > { %v441_v45 = vsel %vm439_vm3, %v434_v40, %v436_v43 }
 0x16d   : > { %v446_v46 = vadd.f32 %v441_v45, %v429_v38 }
 0x16f   : > { %v438_v47 = vpop.permute.xlu0 %437  ;;  %v453_v21 = vpop.permute.xlu1 %452 }
 0x170   : > { %v440_v24 = vsel %vm439_vm3, %v436_v43, %v438_v47  ;;  %v443_v22 = vsel %vm439_vm3, %v438_v47, %v432_v39 }
 0x171   : > { %v444_v23 = vadd.f32 %v443_v22, %v427_v35  ;;  %v447_v48 = vadd.f32 %v440_v24, %v430_v36 }
 0x173   : > { %v455_v49 = vpop.permute.xlu1 %454  ;;  %v451_v50 = vpop.permute.xlu0 %450 }
 0x174   : > { %v457_v51 = vsel %vm456_vm4, %v453_v21, %v455_v49  ;;  %v460_v52 = vsel %vm456_vm4, %v455_v49, %v449_v44  ;;  %v458_v53 = vsel %vm456_vm4, %v451_v50, %v453_v21  ;;  %v459_v54 = vsel %vm456_vm4, %v449_v44, %v451_v50 }
 0x175   : > { %v461_v55 = vadd.f32 %v460_v52, %v444_v23  ;;  %v464_v56 = vadd.f32 %v457_v51, %v447_v48  ;;  %v462_v57 = vadd.f32 %v459_v54, %v445_v42  ;;  %v463_v58 = vadd.f32 %v458_v53, %v446_v46 }
 0x177   : > { %v665_v59 = vpop.permute.xlu1 %664  ;;  %v667_v60 = vpop.permute.xlu0 %666 }
 0x178   : > { %v675_v61 = vsel %vm672_vm5, %v665_v59, %v667_v60 }
 0x17b   : > { %v669_v62 = vpop.permute.xlu1 %668  ;;  %v682_v63 = vpop.permute.xlu0 %681 }
 0x17c   : > { %v674_v0 = vsel %vm672_vm5, %v667_v60, %v669_v62 }
 0x17f   : > { %v671_v1 = vpop.permute.xlu1 %670  ;;  %v686_v2 = vpop.permute.xlu0 %685 }
 0x180   : > { %v673_v3 = vsel %vm672_vm5, %v669_v62, %v671_v1  ;;  %v676_v4 = vsel %vm672_vm5, %v671_v1, %v665_v59 }
 0x183   : > { %v688_v5 = vpop.permute.xlu0 %687  ;;  %v684_v6 = vpop.permute.xlu1 %683 }
 0x184   : > { %v690_v7 = vsel %vm689_vm6, %v686_v2, %v688_v5  ;;  %v693_v8 = vsel %vm689_vm6, %v688_v5, %v682_v63  ;;  %v691_v9 = vsel %vm689_vm6, %v684_v6, %v686_v2  ;;  %v692_v10 = vsel %vm689_vm6, %v682_v63, %v684_v6 }
 0x185   : > { %v694_v11 = vadd.f32 %v693_v8, %v676_v4  ;;  %v697_v12 = vadd.f32 %v690_v7, %v673_v3  ;;  %v695_v13 = vadd.f32 %v692_v10, %v675_v61  ;;  %v696_v14 = vadd.f32 %v691_v9, %v674_v0 }
 0x187   : > { %v703_v15 = vpop.permute.xlu0 %702  ;;  %v699_v16 = vpop.permute.xlu1 %698 }
 0x18b   : > { %v705_v17 = vpop.permute.xlu1 %704  ;;  %v701_v18 = vpop.permute.xlu0 %700 }
 0x18c   : > { %v707_v19 = vsel %vm706_vm7, %v703_v15, %v705_v17  ;;  %v710_v20 = vsel %vm706_vm7, %v705_v17, %v699_v16  ;;  %v708_v27 = vsel %vm706_vm7, %v701_v18, %v703_v15  ;;  %v709_v28 = vsel %vm706_vm7, %v699_v16, %v701_v18 }
 0x18d   : > { %v711_v29 = vadd.f32 %v710_v20, %v694_v11  ;;  %v714_v30 = vadd.f32 %v707_v19, %v697_v12  ;;  %v712_v31 = vadd.f32 %v709_v28, %v695_v13  ;;  %v713_v32 = vadd.f32 %v708_v27, %v696_v14 }
 0x18f   : > { %v720_v33 = vpop.permute.xlu0 %719  ;;  %v716_v34 = vpop.permute.xlu1 %715 }
 0x193   : > { %v722_v35 = vpop.permute.xlu1 %721  ;;  %v718_v36 = vpop.permute.xlu0 %717 }
 0x194   : > { %v724_v37 = vsel %vm723_vm8, %v720_v33, %v722_v35  ;;  %v727_v38 = vsel %vm723_vm8, %v722_v35, %v716_v34  ;;  %v725_v39 = vsel %vm723_vm8, %v718_v36, %v720_v33  ;;  %v726_v40 = vsel %vm723_vm8, %v716_v34, %v718_v36 }
 0x195   : > { %v728_v41 = vadd.f32 %v727_v38, %v711_v29  ;;  %v731_v42 = vadd.f32 %v724_v37, %v714_v30  ;;  %v729_v43 = vadd.f32 %v726_v40, %v712_v31  ;;  %v730_v44 = vadd.f32 %v725_v39, %v713_v32 }
 0x197   : > { %v1754_v45 = vadd.f32 %v728_v41, %v461_v55  ;;  %v1756_v46 = vadd.f32 %v731_v42, %v464_v56  ;;  %v1758_v47 = vadd.f32 %v729_v43, %v462_v57  ;;  %v1760_v21 = vadd.f32 %v730_v44, %v463_v58  ;;  %v932_v24 = vpop.permute.xlu0 %931  ;;  %v934_v22 = vpop.permute.xlu1 %933 }
 0x198   : > { %v942_v6 = vsel %vm939_vm10, %v932_v24, %v934_v22 }
 0x19b   : > { %v936_v23 = vpop.permute.xlu0 %935  ;;  %v949_v48 = vpop.permute.xlu1 %948 }
 0x19c   : > { %v941_v11 = vsel %vm939_vm10, %v934_v22, %v936_v23 }
 0x19f   : > { %v938_v49 = vpop.permute.xlu0 %937  ;;  %v953_v50 = vpop.permute.xlu1 %952 }
 0x1a0   : > { %v940_v12 = vsel %vm939_vm10, %v936_v23, %v938_v49  ;;  %v943_v15 = vsel %vm939_vm10, %v938_v49, %v932_v24 }
 0x1a3   : > { %v955_v51 = vpop.permute.xlu1 %954  ;;  %v951_v52 = vpop.permute.xlu0 %950 }
 0x1a4   : > { %v959_v5 = vsel %vm956_vm9, %v949_v48, %v951_v52  ;;  %v957_v7 = vsel %vm956_vm9, %v953_v50, %v955_v51  ;;  %v960_v8 = vsel %vm956_vm9, %v955_v51, %v949_v48  ;;  %v958_v13 = vsel %vm956_vm9, %v951_v52, %v953_v50 }
 0x1a5   : > { %v962_v16 = vadd.f32 %v959_v5, %v942_v6  ;;  %v961_v19 = vadd.f32 %v960_v8, %v943_v15  ;;  %v964_v20 = vadd.f32 %v957_v7, %v940_v12  ;;  %v963_v29 = vadd.f32 %v958_v13, %v941_v11 }
 0x1a7   : > { %v970_v53 = vpop.permute.xlu1 %969  ;;  %v966_v54 = vpop.permute.xlu0 %965 }
 0x1ab   : > { %v972_v59 = vpop.permute.xlu0 %971  ;;  %v968_v60 = vpop.permute.xlu1 %967 }
 0x1ac   : > { %v976_v14 = vsel %vm973_vm11, %v966_v54, %v968_v60  ;;  %v974_v17 = vsel %vm973_vm11, %v970_v53, %v972_v59  ;;  %v977_v18 = vsel %vm973_vm11, %v972_v59, %v966_v54  ;;  %v975_v27 = vsel %vm973_vm11, %v968_v60, %v970_v53 }
 0x1ad   : > { %v979_v30 = vadd.f32 %v976_v14, %v962_v16  ;;  %v978_v33 = vadd.f32 %v977_v18, %v961_v19  ;;  %v981_v34 = vadd.f32 %v974_v17, %v964_v20  ;;  %v980_v36 = vadd.f32 %v975_v27, %v963_v29 }
 0x1ae   : > { %v1284_v27 = vsub.s32 0, %v1283_v26  ;;  %v1296_v29 = vsub.s32 3, %v1283_v26 }
 0x1af   : > { %v983_v55 = vpop.permute.xlu0 %982  ;;  %v985_v61 = vpop.permute.xlu1 %984 }
 0x1b0   : > { %v993_v28 = vsel %vm990_vm12, %v983_v55, %v985_v61 }
 0x1b1   : > { %v996_v37 = vadd.f32 %v993_v28, %v979_v30  ;;  %v1292_v28 = vsub.s32 2, %v1283_v26 }
 0x1b3   : > { %v987_v56 = vpop.permute.xlu0 %986  ;;  %v1199_v62 = vpop.permute.xlu1 %1198 }
 0x1b4   : > { %v992_v38 = vsel %vm990_vm12, %v985_v61, %v987_v56  ;;  %v1000_v61 = vadd.f32 %v996_v37, %v1758_v47 }
 0x1b7   : > { %v989_v57 = vpop.permute.xlu0 %988  ;;  %v1762_v63 = vpop.permute.xlu1 %1202 }
 0x1b8   : > { %v994_v39 = vsel %vm990_vm12, %v989_v57, %v983_v55  ;;  %v991_v44 = vsel %vm990_vm12, %v987_v56, %v989_v57  ;;  %v997_v56 = vadd.f32 %v992_v38, %v980_v36 }
 0x1b9   : > { %v995_v54 = vadd.f32 %v994_v39, %v978_v33  ;;  %v998_v6 = vadd.f32 %v991_v44, %v981_v34 }
 0x1ba   : > { %v1001_v11 = vadd.f32 %v997_v56, %v1760_v21  ;;  %v1270_v21 = vld [vmem:[%s1847_s3] sm:$0xf] }
 0x1bb   : > { %v1764_v58 = vpop.permute.xlu1 %1204  ;;  %v1201_v0 = vpop.permute.xlu0 %1200  ;;  %v1002_v15 = vadd.f32 %v998_v6, %v1756_v46  ;;  %v1293_v33 = vrot.slane %v1270_v21, %v1292_v28  ;;  %v1297_v34 = vrot.slane %v1270_v21, %v1296_v29 }
 0x1bc   : > { %v1209_v40 = vsel %vm1206_vm14, %v1199_v62, %v1201_v0  ;;  %v1210_v24 = vsel %vm1206_vm14, %v1764_v58, %v1199_v62  ;;  %v1208_v22 = vsel %vm1206_vm14, %v1201_v0, %v1762_v63  ;;  %v1207_v62 = vsel %vm1206_vm14, %v1762_v63, %v1764_v58 }
 0x1bd   : > { %v999_v63 = vadd.f32 %v995_v54, %v1754_v45  ;;  %v1288_v45 = vsub.s32 1, %v1283_v26 }
 0x1bf   : > { %v1216_v1 = vpop.permute.xlu0 %1215  ;;  %v1218_v2 = vpop.permute.xlu1 %1217  ;;  %v1289_v46 = vrot.slane %v1270_v21, %v1288_v45 }
 0x1c0   : > { %v1226_v35 = vsel %vm1223_vm13, %v1216_v1, %v1218_v2 }
 0x1c1   : > { %v1229_v23 = vadd.f32 %v1226_v35, %v1209_v40 }
 0x1c3   : > { %v1220_v3 = vpop.permute.xlu0 %1219  ;;  %v1233_v4 = vpop.permute.xlu1 %1232 }
 0x1c4   : > { %v1225_v41 = vsel %vm1223_vm13, %v1218_v2, %v1220_v3 }
 0x1c5   : > { %v1230_v59 = vadd.f32 %v1225_v41, %v1208_v22 }
 0x1c7   : > { %v1222_v9 = vpop.permute.xlu0 %1221  ;;  %v1237_v10 = vpop.permute.xlu1 %1236 }
 0x1c8   : > { %v1227_v42 = vsel %vm1223_vm13, %v1222_v9, %v1216_v1  ;;  %v1224_v50 = vsel %vm1223_vm13, %v1220_v3, %v1222_v9 }
 0x1c9   : > { %v1228_v60 = vadd.f32 %v1227_v42, %v1210_v24  ;;  %v1231_v0 = vadd.f32 %v1224_v50, %v1207_v62  ;;  %v1316_v50 = vld [vmem:[%s1846_s2] sm:$0xff] }
 0x1cb   : > { %v1239_v31 = vpop.permute.xlu1 %1238  ;;  %v1235_v32 = vpop.permute.xlu0 %1234 }
 0x1cc   : > { %v1243_v43 = vsel %vm1240_vm15, %v1233_v4, %v1235_v32  ;;  %v1244_v51 = vsel %vm1240_vm15, %v1239_v31, %v1233_v4  ;;  %v1242_v52 = vsel %vm1240_vm15, %v1235_v32, %v1237_v10  ;;  %v1241_v57 = vsel %vm1240_vm15, %v1237_v10, %v1239_v31 }
 0x1cd   : > { %v1246_v55 = vadd.f32 %v1243_v43, %v1229_v23  ;;  %v1245_v1 = vadd.f32 %v1244_v51, %v1228_v60  ;;  %v1247_v2 = vadd.f32 %v1242_v52, %v1230_v59  ;;  %v1248_v58 = vadd.f32 %v1241_v57, %v1231_v0 }
 0x1ce   : > { %v1285_v32 = vrot.slane %v1270_v21, %v1284_v27  ;;  %v1532_v51 = vmov 1  }
 0x1cf   : > { %v1250_v48 = vpop.permute.xlu0 %1249  ;;  %v1252_v49 = vpop.permute.xlu1 %1251  ;;  %1501 = vset.pattern.permute.xlu1 %v1532_v51 }
 0x1d0   : > { %v1260_v53 = vsel %vm1257_vm0, %v1250_v48, %v1252_v49 }
 0x1d1   : > { %v1263_v3 = vadd.f32 %v1260_v53, %v1246_v55 }
 0x1d3   : > { %v1256_v4 = vpop.permute.xlu0 %1255  ;;  %v1254_v5 = vpop.permute.xlu1 %1253  ;;  %v1267_v12 = vadd.f32 %v1263_v3, %v1000_v61 }
 0x1d4   : > { %v1261_v7 = vsel %vm1257_vm0, %v1256_v4, %v1250_v48  ;;  %v1258_v47 = vsel %vm1257_vm0, %v1254_v5, %v1256_v4  ;;  %v1259_v8 = vsel %vm1257_vm0, %v1252_v49, %v1254_v5  ;;  %v1531_v49 = vmov 0  }
 0x1d5   : > { %v1262_v9 = vadd.f32 %v1261_v7, %v1245_v1  ;;  %v1264_v10 = vadd.f32 %v1259_v8, %v1247_v2  ;;  %v1265_v14 = vadd.f32 %v1258_v47, %v1248_v58  ;;  %1500 = vset.pattern.permute.xlu0 %v1531_v49 }
 0x1d7   : > { %v1266_v13 = vadd.f32 %v1262_v9, %v999_v63  ;;  %v1268_v16 = vadd.f32 %v1264_v10, %v1001_v11  ;;  %v1269_v18 = vadd.f32 %v1265_v14, %v1002_v15 }
 0x1d9   : > { %v1271_v17 = vadd.f32 %v1267_v12, %v1266_v13 }
 0x1db   : > { %v1272_v19 = vadd.f32 %v1271_v17, %v1268_v16 }
 0x1dd   : > { %v1273_v20 = vadd.f32 %v1272_v19, %v1269_v18 }
 0x1df   : > { %1274 = vadd.xlane.f32.xlu0 %v1273_v20 }
 0x26c   : > { %v1275_v30 = vpop.xlane.xlu0 %1274 }
 0x26d   : > { %v1276_v31 = vmul.f32 0.002770083, %v1275_v30 }
 0x26f   : > { %v1277_v35 = vsub.f32 %v1266_v13, %v1276_v31  ;;  %v1278_v36 = vsub.f32 %v1267_v12, %v1276_v31  ;;  %v1279_v37 = vsub.f32 %v1268_v16, %v1276_v31  ;;  %v1280_v38 = vsub.f32 %v1269_v18, %v1276_v31 }
 0x271   : > { %v1302_v39 = vmul.f32 %v1285_v32, %v1277_v35  ;;  %v1303_v25 = vmul.f32 %v1289_v46, %v1278_v36  ;;  %v1304_v40 = vmul.f32 %v1293_v33, %v1279_v37  ;;  %v1305_v41 = vmul.f32 %v1297_v34, %v1280_v38 }
 0x273   : > { %v1306_v42 = vmul.f32 %v1302_v39, %v1302_v39  ;;  %v1307_v43 = vmul.f32 %v1303_v25, %v1303_v25  ;;  %v1308_v44 = vmul.f32 %v1304_v40, %v1304_v40  ;;  %v1309_v22 = vmul.f32 %v1305_v41, %v1305_v41 }
 0x275   : > { %v1310_v24 = vadd.f32 %v1307_v43, %v1306_v42 }
 0x277   : > { %v1311_v23 = vadd.f32 %v1310_v24, %v1308_v44 }
 0x279   : > { %v1312_v48 = vadd.f32 %v1311_v23, %v1309_v22 }
 0x27b   : > { %1313 = vadd.xlane.f32.xlu1 %v1312_v48 }
 0x28c   : > { %1331 = vperm.xlu1 %1501, %v1316_v50  }
 0x308   : > { %v1314_v52 = vpop.xlane.xlu1 %1313 }
 0x309   : > { %v1315_v53 = vmul.f32 0.002770083, %v1314_v52 }
 0x30b   : > { %v1317_v54 = vadd.f32 1e-05, %v1315_v53 }
 0x30c   : > { %v1332_v61 = vpop.permute.xlu1 %1331 }
 0x30d   : > { %1505 = vrsqrt.f32 %v1317_v54 }
 0x317   : > { %v1506_v59 = vpop.eup %1505 }
 0x318   : > { %v1319_v60 = vmul.f32 %v1506_v59, %v1316_v50 }
 0x31a   : > { %1322 = vperm.xlu0 %1500, %v1319_v60  }
 0x31e   : > { %1502 = vset.pattern.permute.xlu0 %v1532_v51 }
 0x399   : > { %v1323_v55 = vpop.permute.xlu0 %1322 }
 0x39a   : > { %v1325_v56 = vmul.f32 %v1323_v55, %v1277_v35  ;;  %v1326_v62 = vmul.f32 %v1323_v55, %v1278_v36  ;;  %v1327_v57 = vmul.f32 %v1323_v55, %v1279_v37  ;;  %v1328_v0 = vmul.f32 %v1323_v55, %v1280_v38 }
 0x39c   : > { %v1334_v1 = vadd.f32 %v1332_v61, %v1325_v56  ;;  %v1335_v2 = vadd.f32 %v1332_v61, %v1326_v62  ;;  %v1336_v3 = vadd.f32 %v1332_v61, %v1327_v57  ;;  %v1337_v4 = vadd.f32 %v1332_v61, %v1328_v0 }
 0x39e   : > { %v1338_v5 = vmax.f32 %v1334_v1, 0.0  ;;  %v1339_v6 = vmax.f32 %v1335_v2, 0.0  ;;  %v1340_v7 = vmax.f32 %v1336_v3, 0.0  ;;  %v1341_v47 = vmax.f32 %v1337_v4, 0.0 }
 0x3a0   : > { %1342 = vst [vmem:[%s197_s27] sm:$0xff] %v1338_v5  ;;  %1343 = vst [vmem:[%s197_s27 + $0x8] sm:$0xff] %v1339_v6 }
 0x3a1   : > { %1344 = vst [vmem:[%s197_s27 + $0x10] sm:$0xff] %v1340_v7  ;;  %1345 = vst [vmem:[%s197_s27 + $0x18] sm:$0xff] %v1341_v47 }
 0x3a2 PF: > { %s14_s15 = sadd.s32 1, %s1513_s15  }
 0x3a3   : > { %p11_p4 = scmp.ge.s32.totalorder %s14_s15, 4  }
 0x3a5   :  { %13 = sbr.rel (!%p11_p4) target bundleno = 1 (0x1), region = 69 }

</bundles_post_ra>
